<compile_context>
chip_gen: v5e
topology: v5e:2x2
jax: 0.10.0
libtpu: 0.0.40
codegen_flags: <defaults>
</compile_context>

<pallas_src>
import jax
import jax.numpy as jnp
from jax.experimental import pallas as pl
from jax.experimental.pallas import tpu as pltpu


def _round_up(x, m):
    return ((x + m - 1) // m) * m


def _forward_mlp_kernel(f_ref, a_ref, w1f_ref, w1a_ref, b1_ref, w2_ref, b2_ref,
                        o_ref):
    # f:   (TB, Fp) native dtype   a:   (TB, 1) int32
    # w1f: (Fp, Hp)                w1a: (Ap, Hp)        b1: (1, Hp) f32
    # w2:  (Hp, Op)                b2:  (1, Op)  f32    o:  (TB, Op)
    w_dtype = w1f_ref.dtype
    # Cast on the already-loaded vregs (free VPU work) instead of a wrapper-side
    # astype/pad pass that would cost an extra HBM round trip.
    f = f_ref[...].astype(w_dtype)
    tb = f.shape[0]
    a_pad = w1a_ref.shape[0]

    # First linear, feature part (MXU, f32 accumulation).
    h = jnp.dot(f, w1f_ref[...], preferred_element_type=jnp.float32)

    # Action part: in-kernel one-hot (lane iota == action id) times the action
    # rows of W1 — replaces the wrapper-side one_hot + concat HBM round trip.
    lanes = jax.lax.broadcasted_iota(jnp.int32, (tb, a_pad), 1)
    onehot = (lanes == a_ref[...]).astype(w_dtype)
    h = h + jnp.dot(onehot, w1a_ref[...], preferred_element_type=jnp.float32)
    h = h + b1_ref[...]

    # LeakyReLU(0.2) in f32 on the VPU (also sidesteps v5e's missing bf16 VPU).
    h = jnp.where(h > 0, h, 0.2 * h)

    # Second linear (activations cast to the weight storage dtype for the MXU,
    # f32 accumulation).
    y = jnp.dot(h.astype(w2_ref.dtype), w2_ref[...],
                preferred_element_type=jnp.float32)
    y = y + b2_ref[...]
    o_ref[...] = y.astype(o_ref.dtype)


def init_params(key, feature_dim, action_dim, hidden_dim, dtype=jnp.float32):
    """Synthetic init mirroring nn.Linear shapes, stored transposed (in, out)."""
    k1, k2, k3, k4 = jax.random.split(key, 4)
    in_dim = feature_dim + action_dim
    w1 = jax.random.normal(k1, (in_dim, hidden_dim), dtype) * 0.1
    b1 = jax.random.normal(k2, (hidden_dim,), dtype) * 0.1
    w2 = jax.random.normal(k3, (hidden_dim, feature_dim), dtype) * 0.1
    b2 = jax.random.normal(k4, (feature_dim,), dtype) * 0.1
    return {"w1": w1, "b1": b1, "w2": w2, "b2": b2}


def prepare_params(params, feature_dim, action_dim, dtype=jnp.float32):
    """Split W1 into feature/action parts and zero-pad to TPU-friendly shapes.

    `dtype` controls weight storage.  bf16 is recommended on v5e/v6e/v7x (the
    MXU takes bf16 natively and the kernel is HBM-bound); accumulation, biases
    and LeakyReLU always stay f32.
    """
    w1, b1, w2, b2 = params["w1"], params["b1"], params["w2"], params["b2"]
    hidden_dim = w1.shape[1]

    f_pad = _round_up(feature_dim, 8)      # contraction dim (sublanes)
    a_pad = _round_up(action_dim, 8)
    h_pad = _round_up(hidden_dim, 128)     # lane-dense hidden
    o_pad = _round_up(feature_dim, 128)    # lane-dense output (no masked vst)

    w1f = jnp.zeros((f_pad, h_pad), dtype)
    w1f = w1f.at[:feature_dim, :hidden_dim].set(w1[:feature_dim].astype(dtype))
    w1a = jnp.zeros((a_pad, h_pad), dtype)
    w1a = w1a.at[:action_dim, :hidden_dim].set(w1[feature_dim:].astype(dtype))
    b1p = jnp.zeros((1, h_pad), jnp.float32)
    b1p = b1p.at[0, :hidden_dim].set(b1.reshape(-1).astype(jnp.float32))
    w2p = jnp.zeros((h_pad, o_pad), dtype)
    w2p = w2p.at[:hidden_dim, :feature_dim].set(w2.astype(dtype))
    b2p = jnp.zeros((1, o_pad), jnp.float32)
    b2p = b2p.at[0, :feature_dim].set(b2.reshape(-1).astype(jnp.float32))

    return {
        "w1f": w1f, "w1a": w1a, "b1": b1p, "w2": w2p, "b2": b2p,
        "feature_dim": feature_dim, "action_dim": action_dim,
    }


def _choose_batch_tile(b, block_b):
    """Batch tile: multiple of 8 (256 when large), capped at block_b, and at
    least 2 grid steps for non-tiny batches so both v7x TensorCores get work."""
    b8 = _round_up(b, 8)
    if b8 <= 256:
        return b8
    # Two-way split (v7x megacore), rounded to 256 to keep the 2x256 MXU fed.
    return min(_round_up(pl.cdiv(b8, 2), 256), block_b)


def forward_model_apply(f_t, a_t, prepared, *, block_b=2048, out_dtype=None,
                        keep_padded=False):
    """f_t: (B, feature_dim) float; a_t: (B,) int action indices.

    out_dtype: output storage dtype (default f_t.dtype; bf16 halves the write
    stream if downstream tolerates it).
    keep_padded: return the lane-padded (B, o_pad) kernel output directly so a
    fused consumer can skip the trailing slice copy.
    """
    B, F = f_t.shape
    feature_dim = prepared["feature_dim"]
    assert F == feature_dim
    w1f, w1a, b1 = prepared["w1f"], prepared["w1a"], prepared["b1"]
    w2, b2 = prepared["w2"], prepared["b2"]
    f_pad, h_pad = w1f.shape
    a_pad = w1a.shape[0]
    o_pad = w2.shape[1]
    out_dtype = f_t.dtype if out_dtype is None else jnp.dtype(out_dtype)

    # Inputs go in their native dtype (cast happens in-kernel); only pad the
    # feature lane dim if F isn't already 8-aligned.  The batch is NOT padded:
    # grid = cdiv(B, tb) and Pallas masks the ragged final tile's stores.
    x = f_t if f_pad == F else jnp.pad(f_t, ((0, 0), (0, f_pad - F)))
    a = a_t.astype(jnp.int32).reshape(B, 1)

    tb = _choose_batch_tile(B, block_b)
    grid = (pl.cdiv(B, tb),)

    flops = 2 * B * ((f_pad + a_pad) * h_pad + h_pad * o_pad)
    bytes_accessed = (
        x.size * x.dtype.itemsize + a.size * 4
        + w1f.size * w1f.dtype.itemsize + w1a.size * w1a.dtype.itemsize
        + b1.size * 4 + w2.size * w2.dtype.itemsize + b2.size * 4
        + B * o_pad * out_dtype.itemsize
    )

    out = pl.pallas_call(
        _forward_mlp_kernel,
        out_shape=jax.ShapeDtypeStruct((B, o_pad), out_dtype),
        grid_spec=pltpu.PrefetchScalarGridSpec(
            num_scalar_prefetch=0,
            grid=grid,
            in_specs=[
                pl.BlockSpec((tb, f_pad), lambda i: (i, 0)),      # features
                pl.BlockSpec((tb, 1), lambda i: (i, 0)),          # action ids
                pl.BlockSpec((f_pad, h_pad), lambda i: (0, 0)),   # W1 (feat)
                pl.BlockSpec((a_pad, h_pad), lambda i: (0, 0)),   # W1 (action)
                pl.BlockSpec((1, h_pad), lambda i: (0, 0)),       # b1
                pl.BlockSpec((h_pad, o_pad), lambda i: (0, 0)),   # W2
                pl.BlockSpec((1, o_pad), lambda i: (0, 0)),       # b2
            ],
            out_specs=pl.BlockSpec((tb, o_pad), lambda i: (i, 0)),
        ),
        # At these sizes the default scoped VMEM is ample.  For production
        # dims (e.g. F=512, H=1024, tb=4096) on v7x (64 MiB VMEM), also
        # single-buffer the resident weights (pipeline_mode=pl.Buffered(1))
        # and set vmem_limit_bytes explicitly.
        compiler_params=pltpu.CompilerParams(
            dimension_semantics=("parallel",)),
        cost_estimate=pl.CostEstimate(
            flops=int(flops), transcendentals=0,
            bytes_accessed=int(bytes_accessed)),
    )(x, a, w1f, w1a, b1, w2, b2)

    if keep_padded or o_pad == feature_dim:
        return out
    # Trailing lane slice (extra copy) — pass keep_padded=True to fuse instead.
    return out[:, :feature_dim]


def _reference(f_t, a_t, params):
    """Pure-JAX reference of the PyTorch forward."""
    action_dim = params["w1"].shape[0] - f_t.shape[1]
    one_hot = jax.nn.one_hot(a_t, action_dim, dtype=f_t.dtype)
    x = jnp.concatenate([f_t, one_hot], axis=1)
    h = x @ params["w1"] + params["b1"]
    h = jnp.where(h > 0, h, 0.2 * h)
    return h @ params["w2"] + params["b2"]


if __name__ == "__main__":
    feature_dim, action_dim, hidden_dim = 32, 4, 64
    batch = 8

    key = jax.random.PRNGKey(0)
    k_params, k_f, k_a = jax.random.split(key, 3)

    params = init_params(k_params, feature_dim, action_dim, hidden_dim)
    f_t = jax.random.normal(k_f, (batch, feature_dim), jnp.float32)
    a_t = jax.random.randint(k_a, (batch,), 0, action_dim, dtype=jnp.int32)

    ref = _reference(f_t, a_t, params)

    # f32 storage (bit-faithful to the PyTorch module).
    prepared_f32 = prepare_params(params, feature_dim, action_dim,
                                  dtype=jnp.float32)
    out = jax.block_until_ready(forward_model_apply(f_t, a_t, prepared_f32))
    assert out.shape == (batch, feature_dim)
    assert jnp.allclose(out, ref, atol=1e-5, rtol=1e-5)

    # bf16 weight storage + bf16 output (recommended on v5e/v6e/v7x), cast
    # done in-kernel; accumulation stays f32.
    prepared_bf16 = prepare_params(params, feature_dim, action_dim,
                                   dtype=jnp.bfloat16)
    out_bf16 = jax.block_until_ready(
        forward_model_apply(f_t, a_t, prepared_bf16, out_dtype=jnp.bfloat16))
    assert out_bf16.shape == (batch, feature_dim)
    assert jnp.allclose(out_bf16.astype(jnp.float32), ref, atol=5e-2, rtol=5e-2)

    # Multi-tile grid with a ragged final tile (exercises the v7x two-core
    # sharding path and unpadded-batch handling).
    batch2 = 600
    k_f2, k_a2 = jax.random.split(jax.random.PRNGKey(1))
    f2 = jax.random.normal(k_f2, (batch2, feature_dim), jnp.float32)
    a2 = jax.random.randint(k_a2, (batch2,), 0, action_dim, dtype=jnp.int32)
    out2 = jax.block_until_ready(
        forward_model_apply(f2, a2, prepared_f32, block_b=512))
    ref2 = _reference(f2, a2, params)
    assert out2.shape == (batch2, feature_dim)
    assert jnp.allclose(out2, ref2, atol=1e-4, rtol=1e-4)

    print("KERNEL_OK")
</pallas_src>

<mosaic_0001>
module attributes {stable_mosaic.version = 11 : i64} {
  func.func @_forward_mlp_kernel(%arg0: i32, %arg1: memref<8x32xf32, #tpu.memory_space<vmem>>, %arg2: memref<8x1xi32, #tpu.memory_space<vmem>>, %arg3: memref<32x128xf32, #tpu.memory_space<vmem>>, %arg4: memref<8x128xf32, #tpu.memory_space<vmem>>, %arg5: memref<1x128xf32, #tpu.memory_space<vmem>>, %arg6: memref<128x128xf32, #tpu.memory_space<vmem>>, %arg7: memref<1x128xf32, #tpu.memory_space<vmem>>, %arg8: memref<8x128xf32, #tpu.memory_space<vmem>>) attributes {dimension_semantics = [#tpu.dimension_semantics<parallel>], iteration_bounds = array<i64: 1>, scalar_prefetch = 0 : i64, scratch_operands = 0 : i64, tpu.core_type = #tpu.core_type<tc>, window_params = [{transform_indices = @transform_0, window_bounds = array<i64: 8, 32>}, {transform_indices = @transform_1, window_bounds = array<i64: 8, 1>}, {pipeline_mode = #tpu.pipeline_mode<synchronous>, transform_indices = @transform_2, window_bounds = array<i64: 32, 128>}, {pipeline_mode = #tpu.pipeline_mode<synchronous>, transform_indices = @transform_3, window_bounds = array<i64: 8, 128>}, {pipeline_mode = #tpu.pipeline_mode<synchronous>, transform_indices = @transform_4, window_bounds = array<i64: 1, 128>}, {pipeline_mode = #tpu.pipeline_mode<synchronous>, transform_indices = @transform_5, window_bounds = array<i64: 128, 128>}, {pipeline_mode = #tpu.pipeline_mode<synchronous>, transform_indices = @transform_6, window_bounds = array<i64: 1, 128>}, {transform_indices = @transform_7, window_bounds = array<i64: 8, 128>}]} {
    %c0 = arith.constant 0 : index
    %c0_0 = arith.constant 0 : index
    %0 = vector.load %arg1[%c0, %c0_0] : memref<8x32xf32, #tpu.memory_space<vmem>>, vector<8x32xf32>
    %c0_1 = arith.constant 0 : index
    %c0_2 = arith.constant 0 : index
    %1 = vector.load %arg3[%c0_1, %c0_2] : memref<32x128xf32, #tpu.memory_space<vmem>>, vector<32x128xf32>
    %cst = arith.constant dense<0.000000e+00> : vector<8x128xf32>
    %2 = tpu.matmul %0, %1, %cst {dimension_numbers = #tpu.dot_dimension_numbers<[1], [0], [0], [1], [0, 0, 1, 1], [], []>} : vector<8x32xf32>, vector<32x128xf32>, vector<8x128xf32> -> vector<8x128xf32>
    %3 = tpu.iota {dimensions = array<i32: 1>} : vector<8x8xi32>
    %c0_3 = arith.constant 0 : index
    %c0_4 = arith.constant 0 : index
    %4 = vector.load %arg2[%c0_3, %c0_4] : memref<8x1xi32, #tpu.memory_space<vmem>>, vector<8x1xi32>
    %5 = vector.broadcast %4 : vector<8x1xi32> to vector<8x8xi32>
    %6 = arith.cmpi eq, %3, %5 : vector<8x8xi32>
    %7 = arith.extui %6 : vector<8x8xi1> to vector<8x8xi32>
    %8 = arith.sitofp %7 : vector<8x8xi32> to vector<8x8xf32>
    %c0_5 = arith.constant 0 : index
    %c0_6 = arith.constant 0 : index
    %9 = vector.load %arg4[%c0_5, %c0_6] : memref<8x128xf32, #tpu.memory_space<vmem>>, vector<8x128xf32>
    %cst_7 = arith.constant dense<0.000000e+00> : vector<8x128xf32>
    %10 = tpu.matmul %8, %9, %cst_7 {dimension_numbers = #tpu.dot_dimension_numbers<[1], [0], [0], [1], [0, 0, 1, 1], [], []>} : vector<8x8xf32>, vector<8x128xf32>, vector<8x128xf32> -> vector<8x128xf32>
    %11 = arith.addf %2, %10 : vector<8x128xf32>
    %c0_8 = arith.constant 0 : index
    %c0_9 = arith.constant 0 : index
    %12 = vector.load %arg5[%c0_8, %c0_9] : memref<1x128xf32, #tpu.memory_space<vmem>>, vector<1x128xf32>
    %13 = vector.broadcast %12 : vector<1x128xf32> to vector<8x128xf32>
    %14 = arith.addf %11, %13 : vector<8x128xf32>
    %cst_10 = arith.constant 0.000000e+00 : f32
    %15 = vector.broadcast %cst_10 : f32 to vector<8x128xf32>
    %16 = arith.cmpf ogt, %14, %15 : vector<8x128xf32>
    %cst_11 = arith.constant 2.000000e-01 : f32
    %17 = vector.broadcast %cst_11 : f32 to vector<8x128xf32>
    %18 = arith.mulf %17, %14 : vector<8x128xf32>
    %19 = arith.select %16, %14, %18 : vector<8x128xi1>, vector<8x128xf32>
    %c0_12 = arith.constant 0 : index
    %c0_13 = arith.constant 0 : index
    %20 = vector.load %arg6[%c0_12, %c0_13] : memref<128x128xf32, #tpu.memory_space<vmem>>, vector<128x128xf32>
    %cst_14 = arith.constant dense<0.000000e+00> : vector<8x128xf32>
    %21 = tpu.matmul %19, %20, %cst_14 {dimension_numbers = #tpu.dot_dimension_numbers<[1], [0], [0], [1], [0, 0, 1, 1], [], []>} : vector<8x128xf32>, vector<128x128xf32>, vector<8x128xf32> -> vector<8x128xf32>
    %c0_15 = arith.constant 0 : index
    %c0_16 = arith.constant 0 : index
    %22 = vector.load %arg7[%c0_15, %c0_16] : memref<1x128xf32, #tpu.memory_space<vmem>>, vector<1x128xf32>
    %23 = vector.broadcast %22 : vector<1x128xf32> to vector<8x128xf32>
    %24 = arith.addf %21, %23 : vector<8x128xf32>
    %c0_17 = arith.constant 0 : index
    %c0_18 = arith.constant 0 : index
    %25 = vector.load %arg8[%c0_17, %c0_18] : memref<8x128xf32, #tpu.memory_space<vmem>>, vector<8x128xf32>
    tpu.vector_store %arg8[%c0_17, %c0_18], %24 {strides = array<i32>} : memref<8x128xf32, #tpu.memory_space<vmem>>, vector<8x128xf32>,
    return
  }
  func.func @transform_0(%arg0: i32) -> (i32, i32) {
    %c0_i32 = arith.constant 0 : i32
    %c0_i32_0 = arith.constant 0 : i32
    return %arg0, %c0_i32 : i32, i32
  }
  func.func @transform_1(%arg0: i32) -> (i32, i32) {
    %c0_i32 = arith.constant 0 : i32
    %c0_i32_0 = arith.constant 0 : i32
    return %arg0, %c0_i32 : i32, i32
  }
  func.func @transform_2(%arg0: i32) -> (i32, i32) {
    %c0_i32 = arith.constant 0 : i32
    %c0_i32_0 = arith.constant 0 : i32
    %c0_i32_1 = arith.constant 0 : i32
    return %c0_i32, %c0_i32_0 : i32, i32
  }
  func.func @transform_3(%arg0: i32) -> (i32, i32) {
    %c0_i32 = arith.constant 0 : i32
    %c0_i32_0 = arith.constant 0 : i32
    %c0_i32_1 = arith.constant 0 : i32
    return %c0_i32, %c0_i32_0 : i32, i32
  }
  func.func @transform_4(%arg0: i32) -> (i32, i32) {
    %c0_i32 = arith.constant 0 : i32
    %c0_i32_0 = arith.constant 0 : i32
    %c0_i32_1 = arith.constant 0 : i32
    return %c0_i32, %c0_i32_0 : i32, i32
  }
  func.func @transform_5(%arg0: i32) -> (i32, i32) {
    %c0_i32 = arith.constant 0 : i32
    %c0_i32_0 = arith.constant 0 : i32
    %c0_i32_1 = arith.constant 0 : i32
    return %c0_i32, %c0_i32_0 : i32, i32
  }
  func.func @transform_6(%arg0: i32) -> (i32, i32) {
    %c0_i32 = arith.constant 0 : i32
    %c0_i32_0 = arith.constant 0 : i32
    %c0_i32_1 = arith.constant 0 : i32
    return %c0_i32, %c0_i32_0 : i32, i32
  }
  func.func @transform_7(%arg0: i32) -> (i32, i32) {
    %c0_i32 = arith.constant 0 : i32
    %c0_i32_0 = arith.constant 0 : i32
    return %arg0, %c0_i32 : i32, i32
  }
}

</mosaic_0001>

<bundles_post_ra>
// kernel: tpu_custom_call.1
= control target key start
LH: loop header
LB: loop body
LE: loop exit
PB: predicated region body
PF: predicated region fallthrough
CT: control target
= control target key end

     0   :  { %12 = vsyncpa [#allocation3], 0  ;;  %s390_s0 = inlined_call_operand.vmem [shape: f32[8,32], index: 0, kind: input, shape index: {}]   ;;  %s391_s1 = inlined_call_operand.vmem [shape: s32[8,1], index: 1, kind: input, shape index: {}]   ;;  %s392_s2 = inlined_call_operand.hbm [shape: f32[32,128], index: 2, kind: input, shape index: {}]   ;;  %s393_s3 = inlined_call_operand.hbm [shape: f32[8,128], index: 3, kind: input, shape index: {}]   ;;  %s394_s4 = inlined_call_operand.vmem [shape: f32[1,128], index: 4, kind: input, shape index: {}]   ;;  %s395_s5 = inlined_call_operand.hbm [shape: f32[128,128], index: 5, kind: input, shape index: {}]   ;;  %s396_s6 = inlined_call_operand.vmem [shape: f32[1,128], index: 6, kind: input, shape index: {}]   ;;  %s397_s7 = inlined_call_operand.hbm [shape: f32[8,128], index: 7, kind: output, shape index: {}]  }
   0x1   :  { %13 = vsyncpa [#allocation6], 0  ;;  %s37_s26 = sshll.u32 %s393_s3, 4  ;;  %s38_s26 = int_to_ptr.hbm [resolvable:$true] %s37_s26 }
   0x2   :  { %14 = vsyncpa [#allocation4], 0  ;;  %s318_s27 = smov [#allocation5]   ;;  %s23_s8 = sshll.u32 %s392_s2, 4  ;;  %s24_s8 = int_to_ptr.hbm [resolvable:$true] %s23_s8 }
   0x3   :  { %s39_s28 = sshll.u32 %s318_s27, 4  ;;  %s319_s9 = smov [#allocation2]   ;;  %s40_s28 = int_to_ptr.vmem [resolvable:$true] %s39_s28 }
   0x4   :  { %42 = dma.hbm_to_vmem [thread:$0]  %s38_s26, 128, %s40_s28, [#allocation6]  }
   0x5   :  { %s25_s10 = sshll.u32 %s319_s9, 4  ;;  %s320_s11 = smov 128   ;;  %s26_s10 = int_to_ptr.vmem [resolvable:$true] %s25_s10 }
   0x6   :  { %s321_s12 = smov 8   ;;  %s49_s3 = sshll.u32 %s395_s5, 4  ;;  %s50_s3 = int_to_ptr.hbm [resolvable:$true] %s49_s3 }
   0x7   :  { %31 = dma.hbm_to_vmem [thread:$0]  %s24_s8, 512, %s26_s10, [#allocation3], %s320_s11, %s320_s11, %s321_s12  }
   0x8   :  { %s322_s15 = smov [#allocation7]  }
   0x9   :  { %s51_s16 = sshll.u32 %s322_s15, 4  ;;  %s52_s16 = int_to_ptr.vmem [resolvable:$true] %s51_s16 }
   0xa   :  { %57 = dma.hbm_to_vmem [thread:$0]  %s50_s3, 2048, %s52_s16, [#allocation6], %s320_s11, %s320_s11, %s321_s12  }
   0xb   :  { %312 = dma.done.wait [#allocation3], 512  }
   0xc   :  { %313 = vsyncadd [#allocation3], 4294966784 }
   0xd   :  { %314 = dma.done.wait [#allocation6], 2176  }
   0xe   :  { %315 = vsyncadd [#allocation6], 4294965120  ;;  %v323_v0 = vmov 0   ;;  %v79_v1 = vld [vmem:[%s391_s1] sm:$0xff]  ;;  %v76_v2 = vld [vmem:[#allocation2 + $0x18] sm:$0xff]  ;;  %vm111_vm0 = vcmask 261120   ;;  %v77_v20 = vlaneseq }
   0xf   :  { %213 = vset.pattern.permute.xlu0 %v323_v0  ;;  %v75_v3 = vld [vmem:[#allocation2 + $0x10] sm:$0xff]  ;;  %127 = vmatpush.msra.mxu1 %v76_v2  ;;  %v74_v4 = vld [vmem:[#allocation2 + $0x8] sm:$0xff]  ;;  %v86_v5 = vld [vmem:[#allocation5] sm:$0xff]  ;;  %vm87_vm1 = vcmask 64512   ;;  %v324_v23 = vmov 0.0   ;;  %s325_s21 = smov [#allocation8]  }
  0x10   :  { %81 = vperm.xlu0 %213, %v79_v1   ;;  %v73_v6 = vld [vmem:[#allocation2] sm:$0xff]  ;;  %106 = vmatpush.msra.mxu0 %v86_v5  ;;  %v157_v9 = vld [vmem:[#allocation7 + $0x70] sm:$0xff]  ;;  %v156_v10 = vld [vmem:[#allocation7 + $0x68] sm:$0xff]  ;;  %v78_v21 = vand.u32 127, %v77_v20  ;;  %s189_s22 = sshll.u32 %s325_s21, 4  ;;  %s191_s25 = sshll.u32 %s397_s7, 4  ;;  %s190_s22 = int_to_ptr.vmem [resolvable:$true] %s189_s22  ;;  %s192_s25 = int_to_ptr.hbm [resolvable:$true] %s191_s25 }
  0x11   :  { %128 = vmatpush.msra.mxu1 %v75_v3  ;;  %v72_v7 = vld [vmem:[%s390_s0] sm:$0xff]  ;;  %v155_v11 = vld [vmem:[#allocation7 + $0x60] sm:$0xff]  ;;  %v153_v13 = vld [vmem:[#allocation7 + $0x50] sm:$0xff] }
  0x12   :  { %v158_v8 = vld [vmem:[#allocation7 + $0x78] sm:$0xff]  ;;  %v152_v14 = vld [vmem:[#allocation7 + $0x48] sm:$0xff]  ;;  %v151_v15 = vld [vmem:[#allocation7 + $0x40] sm:$0xff] }
  0x13   :  { %129 = vmatpush.msra.mxu1 %v74_v4  ;;  %163 = vmatpush.msra.mxu2 %v158_v8  ;;  %v154_v12 = vld [vmem:[#allocation7 + $0x58] sm:$0xff]  ;;  %v149_v17 = vld [vmem:[#allocation7 + $0x30] sm:$0xff]  ;;  %v148_v18 = vld [vmem:[#allocation7 + $0x28] sm:$0xff] }
  0x14   :  { %v150_v16 = vld [vmem:[#allocation7 + $0x38] sm:$0xff]  ;;  %v147_v19 = vld [vmem:[#allocation7 + $0x20] sm:$0xff]  ;;  %v145_v26 = vld [vmem:[#allocation7 + $0x10] sm:$0xff] }
  0x15   :  { %130 = vmatpush.msra.mxu1 %v73_v6  ;;  %164 = vmatpush.msra.mxu2 %v157_v9  ;;  %v146_v25 = vld [vmem:[#allocation7 + $0x18] sm:$0xff]  ;;  %v144_v27 = vld [vmem:[#allocation7 + $0x8] sm:$0xff]  ;;  %v143_v28 = vld [vmem:[#allocation7] sm:$0xff] }
  0x16   :  { %204 = vmatmul.msk.f32.vlgmr.msra.gmra.mxu1 %vm111_vm0, %v72_v7  ;;  %v214_v30 = vld [vmem:[%s394_s4] ss:$0 sm:$0xff] }
  0x17   :  { %165 = vmatpush.msra.mxu2 %v156_v10  ;;  %v215_v36 = vld [vmem:[%s396_s6] ss:$0 sm:$0xff] }
  0x19   :  { %166 = vmatpush.msra.mxu2 %v155_v11 }
  0x1b   :  { %167 = vmatpush.msra.mxu2 %v154_v12 }
  0x1d   :  { %168 = vmatpush.msra.mxu2 %v153_v13 }
  0x1f   :  { %169 = vmatpush.msra.mxu2 %v152_v14 }
  0x21   :  { %170 = vmatpush.msra.mxu2 %v151_v15 }
  0x23   :  { %171 = vmatpush.msra.mxu2 %v150_v16 }
  0x25   :  { %172 = vmatpush.msra.mxu2 %v149_v17 }
  0x27   :  { %173 = vmatpush.msra.mxu2 %v148_v18 }
  0x29   :  { %174 = vmatpush.msra.mxu2 %v147_v19 }
  0x2b   :  { %175 = vmatpush.msra.mxu2 %v146_v25 }
  0x2d   :  { %176 = vmatpush.msra.mxu2 %v145_v26 }
  0x2f   :  { %177 = vmatpush.msra.mxu2 %v144_v27 }
  0x31   :  { %178 = vmatpush.msra.mxu2 %v143_v28 }
  0x82   :  { %v82_v22 = vpop.permute.xlu0 %81 }
  0x83   :  { %vm83_vm2 = vcmp.eq.s32.totalorder %v78_v21, %v82_v22 }
  0x84   :  { %v202_v24 = vsel %vm83_vm2, 1.0, %v324_v23 }
  0x85   :  { %203 = vmatmul.msk.f32.vlgmr.msra.gmra.mxu0 %vm87_vm1, %v202_v24 }
  0x93   :  { %v132_v29 = vpop.f32.mrf.mxu1 }
 0x102   :  { %v108_v31 = vpop.f32.mrf.mxu0 }
 0x103   :  { %v133_v32 = vadd.f32 %v132_v29, %v108_v31 }
 0x105   :  { %v139_v33 = vadd.f32 %v214_v30, %v133_v32 }
 0x107   :  { %vm140_vm3 = vcmp.gt.f32.partialorder %v139_v33, 0.0  ;;  %v141_v34 = vmul.f32 0.2, %v139_v33 }
 0x109   :  { %v142_v35 = vsel %vm140_vm3, %v139_v33, %v141_v34 }
 0x10a   :  { %179 = vmatmul.f32.vlgmr.msra.gmra.mxu2 %v142_v35 }
 0x18d   :  { %v180_v37 = vpop.f32.mrf.mxu2 }
 0x18e   :  { %v181_v38 = vadd.f32 %v215_v36, %v180_v37 }
 0x190   :  { %183 = vst [vmem:[#allocation8] sm:$0xff] %v181_v38 }
 0x191   :  { %194 = dma.vmem_to_hbm [thread:$0]  %s190_s22, 128, %s192_s25, [#allocation4]  }
 0x192   :  { %316 = dma.done.wait [#allocation4], 128  }
 0x193   :  { %317 = vsyncadd [#allocation4], 4294967168 }
 0x194   :  { %199 = vsyncpa [#allocation3], 1 }
 0x195   :  { %200 = vsyncpa [#allocation6], 1 }
 0x196   :  { %201 = vsyncpa [#allocation4], 1 }

</bundles_post_ra>
